<compile_context>
chip_gen: v6e
topology: v6e:2x2x1
jax: 0.10.0
libtpu: 0.0.40
codegen_flags: <defaults>
</compile_context>

<pallas_src>
import math
import functools

import jax
import jax.numpy as jnp
from jax.experimental import pallas as pl
from jax.experimental.pallas import tpu as pltpu


def _round_up(x, m):
    return ((x + m - 1) // m) * m


# ----------------------------------------------------------------------------
# Kernels
# ----------------------------------------------------------------------------
def _linear_acc_kernel(x_ref, w_ref, b_ref, o_ref, acc_ref):
    """One (tm, tn) output tile of y = x @ W_t + b, accumulating over K tiles."""
    k = pl.program_id(2)

    @pl.when(k == 0)
    def _():
        acc_ref[...] = jnp.zeros_like(acc_ref)

    acc_ref[...] += jnp.dot(
        x_ref[...], w_ref[...], preferred_element_type=jnp.float32
    )

    @pl.when(k == pl.num_programs(2) - 1)
    def _():
        o_ref[...] = (acc_ref[...] + b_ref[...]).astype(o_ref.dtype)


def _linear_nok_kernel(x_ref, w_ref, b_ref, o_ref):
    """Single-K-tile fast path: no reduction axis, no accumulator scratch."""
    y = jnp.dot(x_ref[...], w_ref[...], preferred_element_type=jnp.float32)
    o_ref[...] = (y + b_ref[...]).astype(o_ref.dtype)


# ----------------------------------------------------------------------------
# Wrapper around pallas_call (operates on already-padded operands)
# ----------------------------------------------------------------------------
def _vmem_limit_bytes(tm, tn, tk, x_dtype, w_dtype, out_dtype):
    est = (
        2 * tm * tk * jnp.dtype(x_dtype).itemsize      # x tiles (double-buffered)
        + 2 * tk * tn * jnp.dtype(w_dtype).itemsize    # weight tiles (dominant)
        + 2 * 1 * tn * 4                               # bias tiles
        + 2 * tm * tn * jnp.dtype(out_dtype).itemsize  # output tiles
        + tm * tn * 4                                  # f32 accumulator scratch
    )
    # >= default scoped 32 MiB, and comfortably under v7x's 64 MiB physical VMEM.
    return int(min(48 * 2**20, max(32 * 2**20, int(est * 1.4))))


def _linear_padded(x, w_t, b, *, tm, tn, tk):
    """y = x @ w_t + b on padded operands.

    x: [Mp, Kp] (f32), w_t: [Kp, Np] (bf16 or f32, stored as [in, out]),
    b: [1, Np] (f32).  All dims must be exact multiples of the tile sizes.
    """
    Mp, Kp = x.shape
    Kp2, Np = w_t.shape
    assert Kp == Kp2 and b.shape == (1, Np)
    assert Mp % tm == 0 and Np % tn == 0 and Kp % tk == 0

    out_shape = jax.ShapeDtypeStruct((Mp, Np), x.dtype)

    if Kp == tk:
        # Whole K fits one tile: drop the reduction axis / accumulator entirely.
        vmem = _vmem_limit_bytes(tm, tn, Kp, x.dtype, w_t.dtype, x.dtype)
        return pl.pallas_call(
            _linear_nok_kernel,
            out_shape=out_shape,
            grid_spec=pltpu.PrefetchScalarGridSpec(
                num_scalar_prefetch=0,
                grid=(Mp // tm, Np // tn),
                in_specs=[
                    pl.BlockSpec((tm, Kp), lambda i, j: (i, 0)),   # x
                    pl.BlockSpec((Kp, tn), lambda i, j: (0, j)),   # w_t
                    pl.BlockSpec((1, tn), lambda i, j: (0, j)),    # bias
                ],
                out_specs=pl.BlockSpec((tm, tn), lambda i, j: (i, j)),
            ),
            compiler_params=pltpu.CompilerParams(
                dimension_semantics=("parallel", "parallel"),
                vmem_limit_bytes=vmem,
            ),
        )(x, w_t, b)

    vmem = _vmem_limit_bytes(tm, tn, tk, x.dtype, w_t.dtype, x.dtype)
    return pl.pallas_call(
        _linear_acc_kernel,
        out_shape=out_shape,
        grid_spec=pltpu.PrefetchScalarGridSpec(
            num_scalar_prefetch=0,
            grid=(Mp // tm, Np // tn, Kp // tk),
            in_specs=[
                pl.BlockSpec((tm, tk), lambda i, j, k: (i, k)),    # x
                pl.BlockSpec((tk, tn), lambda i, j, k: (k, j)),    # w_t
                pl.BlockSpec((1, tn), lambda i, j, k: (0, j)),     # bias
            ],
            out_specs=pl.BlockSpec((tm, tn), lambda i, j, k: (i, j)),
            scratch_shapes=[pltpu.VMEM((tm, tn), jnp.float32)],
        ),
        compiler_params=pltpu.CompilerParams(
            dimension_semantics=("parallel", "parallel", "arbitrary"),
            vmem_limit_bytes=vmem,
        ),
    )(x, w_t, b)


# ----------------------------------------------------------------------------
# Parameter preparation (pad + cast ONCE, outside the hot path) and forward
# ----------------------------------------------------------------------------
def prepare_params(raw_params, *, tn=2048, tk=2048, weight_dtype=jnp.bfloat16):
    """Pad weights/biases to tile multiples and cast weights (e.g. to bf16).

    raw_params: list of (w_t [H, H] = W.T stored as [in, out], b [H]) in f32.
    """
    H = raw_params[0][0].shape[0]
    tn = min(tn, _round_up(H, 128))
    tk = min(tk, _round_up(H, 128))
    Hp = _round_up(H, math.lcm(tn, tk))

    layers = []
    for w_t, b in raw_params:
        w_pad = (
            jnp.zeros((Hp, Hp), weight_dtype).at[:H, :H].set(w_t.astype(weight_dtype))
        )
        b_pad = jnp.zeros((1, Hp), jnp.float32).at[0, :H].set(b.astype(jnp.float32))
        layers.append((w_pad, b_pad))
    return {"H": H, "Hp": Hp, "tn": tn, "tk": tk, "layers": layers}


def layer_forward(x, prepared):
    """Sequentially apply the 10 linear layers (== `Layer.forward` semantics)."""
    M, H = x.shape
    assert H == prepared["H"], "input feature dim does not match the parameters"
    Hp, tn, tk = prepared["Hp"], prepared["tn"], prepared["tk"]

    tm = min(256, _round_up(M, 8))
    Mp = _round_up(M, tm)

    # Pad once; zero feature-padding propagates exactly through every layer.
    y = jnp.zeros((Mp, Hp), x.dtype).at[:M, :H].set(x)
    for w_pad, b_pad in prepared["layers"]:
        y = _linear_padded(y, w_pad, b_pad, tm=tm, tn=tn, tk=tk)
    return y[:M, :H]


def init_params(key, hidden, n_layers=10, dtype=jnp.float32):
    """nn.Linear default init: U(-1/sqrt(in), 1/sqrt(in)); weights stored [in, out]."""
    params = []
    bound = 1.0 / (hidden ** 0.5)
    for _ in range(n_layers):
        kw, kb, key = jax.random.split(key, 3)
        w_t = jax.random.uniform(kw, (hidden, hidden), dtype, -bound, bound)
        b = jax.random.uniform(kb, (hidden,), dtype, -bound, bound)
        params.append((w_t, b))
    return params


if __name__ == "__main__":
    # Small shapes consistent with the module (Linear(H, H) x 10).  The real
    # module uses H=10000 (not a multiple of 128); H=300 / batch=4 exercises
    # the same padding logic at a tiny size.
    BATCH, HIDDEN, N_LAYERS = 4, 300, 10

    key = jax.random.PRNGKey(0)
    kx, kp = jax.random.split(key)
    x = jax.random.normal(kx, (BATCH, HIDDEN), jnp.float32)
    raw_params = init_params(kp, HIDDEN, N_LAYERS)

    # 1) Default (large-tile, bf16-weight) configuration: exercises padding and
    #    the single-K-tile fast path at this small H.
    prepared = prepare_params(raw_params, tn=2048, tk=2048, weight_dtype=jnp.bfloat16)
    y = jax.jit(lambda xx: layer_forward(xx, prepared))(x)
    jax.block_until_ready(y)

    # 2) Forced small tiles: exercises the K-reduction accumulator path.
    prepared_small = prepare_params(raw_params, tn=128, tk=128,
                                    weight_dtype=jnp.bfloat16)
    y_small = jax.jit(lambda xx: layer_forward(xx, prepared_small))(x)
    jax.block_until_ready(y_small)

    # Pure-JAX reference with the same bf16-rounded weights and f32 math.
    y_ref = x
    for w_t, b in raw_params:
        y_ref = y_ref @ w_t.astype(jnp.bfloat16).astype(jnp.float32) + b

    assert y.shape == (BATCH, HIDDEN)
    assert jnp.allclose(y, y_ref, atol=1e-3, rtol=5e-2), "default-tile mismatch vs reference"
    assert jnp.allclose(y_small, y_ref, atol=1e-3, rtol=5e-2), "small-tile mismatch vs reference"

    print("KERNEL_OK")
</pallas_src>

<mosaic_0001>
module attributes {stable_mosaic.version = 11 : i64} {
  func.func @_linear_nok_kernel(%arg0: i32, %arg1: i32, %arg2: memref<8x384xf32, #tpu.memory_space<vmem>>, %arg3: memref<384x384xbf16, #tpu.memory_space<vmem>>, %arg4: memref<1x384xf32, #tpu.memory_space<vmem>>, %arg5: memref<8x384xf32, #tpu.memory_space<vmem>>) attributes {dimension_semantics = [#tpu.dimension_semantics<parallel>, #tpu.dimension_semantics<parallel>], iteration_bounds = array<i64: 1, 1>, scalar_prefetch = 0 : i64, scratch_operands = 0 : i64, tpu.core_type = #tpu.core_type<tc>, window_params = [{transform_indices = @transform_0, window_bounds = array<i64: 8, 384>}, {transform_indices = @transform_1, window_bounds = array<i64: 384, 384>}, {transform_indices = @transform_2, window_bounds = array<i64: 1, 384>}, {transform_indices = @transform_3, window_bounds = array<i64: 8, 384>}]} {
    %c0 = arith.constant 0 : index
    %c0_0 = arith.constant 0 : index
    %0 = vector.load %arg2[%c0, %c0_0] : memref<8x384xf32, #tpu.memory_space<vmem>>, vector<8x384xf32>
    %c0_1 = arith.constant 0 : index
    %c0_2 = arith.constant 0 : index
    %1 = vector.load %arg3[%c0_1, %c0_2] : memref<384x384xbf16, #tpu.memory_space<vmem>>, vector<384x384xbf16>
    %cst = arith.constant dense<0.000000e+00> : vector<8x384xf32>
    %2 = tpu.matmul %0, %1, %cst {dimension_numbers = #tpu.dot_dimension_numbers<[1], [0], [0], [1], [0, 0, 1, 1], [], []>} : vector<8x384xf32>, vector<384x384xbf16>, vector<8x384xf32> -> vector<8x384xf32>
    %c0_3 = arith.constant 0 : index
    %c0_4 = arith.constant 0 : index
    %3 = vector.load %arg4[%c0_3, %c0_4] : memref<1x384xf32, #tpu.memory_space<vmem>>, vector<1x384xf32>
    %4 = vector.broadcast %3 : vector<1x384xf32> to vector<8x384xf32>
    %5 = arith.addf %2, %4 : vector<8x384xf32>
    %c0_5 = arith.constant 0 : index
    %c0_6 = arith.constant 0 : index
    %6 = vector.load %arg5[%c0_5, %c0_6] : memref<8x384xf32, #tpu.memory_space<vmem>>, vector<8x384xf32>
    tpu.vector_store %arg5[%c0_5, %c0_6], %5 {strides = array<i32>} : memref<8x384xf32, #tpu.memory_space<vmem>>, vector<8x384xf32>,
    return
  }
  func.func @transform_0(%arg0: i32, %arg1: i32) -> (i32, i32) {
    %c0_i32 = arith.constant 0 : i32
    %c0_i32_0 = arith.constant 0 : i32
    return %arg0, %c0_i32 : i32, i32
  }
  func.func @transform_1(%arg0: i32, %arg1: i32) -> (i32, i32) {
    %c0_i32 = arith.constant 0 : i32
    %c0_i32_0 = arith.constant 0 : i32
    return %c0_i32, %arg1 : i32, i32
  }
  func.func @transform_2(%arg0: i32, %arg1: i32) -> (i32, i32) {
    %c0_i32 = arith.constant 0 : i32
    %c0_i32_0 = arith.constant 0 : i32
    return %c0_i32, %arg1 : i32, i32
  }
  func.func @transform_3(%arg0: i32, %arg1: i32) -> (i32, i32) {
    %c0_i32 = arith.constant 0 : i32
    return %arg0, %arg1 : i32, i32
  }
}

module attributes {stable_mosaic.version = 11 : i64} {
  func.func @_linear_nok_kernel(%arg0: i32, %arg1: i32, %arg2: memref<8x384xf32, #tpu.memory_space<vmem>>, %arg3: memref<384x384xbf16, #tpu.memory_space<vmem>>, %arg4: memref<1x384xf32, #tpu.memory_space<vmem>>, %arg5: memref<8x384xf32, #tpu.memory_space<vmem>>) attributes {dimension_semantics = [#tpu.dimension_semantics<parallel>, #tpu.dimension_semantics<parallel>], iteration_bounds = array<i64: 1, 1>, scalar_prefetch = 0 : i64, scratch_operands = 0 : i64, tpu.core_type = #tpu.core_type<tc>, window_params = [{transform_indices = @transform_0, window_bounds = array<i64: 8, 384>}, {transform_indices = @transform_1, window_bounds = array<i64: 384, 384>}, {transform_indices = @transform_2, window_bounds = array<i64: 1, 384>}, {transform_indices = @transform_3, window_bounds = array<i64: 8, 384>}]} {
    %c0 = arith.constant 0 : index
    %c0_0 = arith.constant 0 : index
    %0 = vector.load %arg2[%c0, %c0_0] : memref<8x384xf32, #tpu.memory_space<vmem>>, vector<8x384xf32>
    %c0_1 = arith.constant 0 : index
    %c0_2 = arith.constant 0 : index
    %1 = vector.load %arg3[%c0_1, %c0_2] : memref<384x384xbf16, #tpu.memory_space<vmem>>, vector<384x384xbf16>
    %cst = arith.constant dense<0.000000e+00> : vector<8x384xf32>
    %2 = tpu.matmul %0, %1, %cst {dimension_numbers = #tpu.dot_dimension_numbers<[1], [0], [0], [1], [0, 0, 1, 1], [], []>} : vector<8x384xf32>, vector<384x384xbf16>, vector<8x384xf32> -> vector<8x384xf32>
    %c0_3 = arith.constant 0 : index
    %c0_4 = arith.constant 0 : index
    %3 = vector.load %arg4[%c0_3, %c0_4] : memref<1x384xf32, #tpu.memory_space<vmem>>, vector<1x384xf32>
    %4 = vector.broadcast %3 : vector<1x384xf32> to vector<8x384xf32>
    %5 = arith.addf %2, %4 : vector<8x384xf32>
    %c0_5 = arith.constant 0 : index
    %c0_6 = arith.constant 0 : index
    %6 = vector.load %arg5[%c0_5, %c0_6] : memref<8x384xf32, #tpu.memory_space<vmem>>, vector<8x384xf32>
    tpu.vector_store %arg5[%c0_5, %c0_6], %5 {strides = array<i32>} : memref<8x384xf32, #tpu.memory_space<vmem>>, vector<8x384xf32>,
    return
  }
  func.func @transform_0(%arg0: i32, %arg1: i32) -> (i32, i32) {
    %c0_i32 = arith.constant 0 : i32
    %c0_i32_0 = arith.constant 0 : i32
    return %arg0, %c0_i32 : i32, i32
  }
  func.func @transform_1(%arg0: i32, %arg1: i32) -> (i32, i32) {
    %c0_i32 = arith.constant 0 : i32
    %c0_i32_0 = arith.constant 0 : i32
    return %c0_i32, %arg1 : i32, i32
  }
  func.func @transform_2(%arg0: i32, %arg1: i32) -> (i32, i32) {
    %c0_i32 = arith.constant 0 : i32
    %c0_i32_0 = arith.constant 0 : i32
    return %c0_i32, %arg1 : i32, i32
  }
  func.func @transform_3(%arg0: i32, %arg1: i32) -> (i32, i32) {
    %c0_i32 = arith.constant 0 : i32
    return %arg0, %arg1 : i32, i32
  }
}

</mosaic_0001>

<bundles_post_ra>
// kernel: _lambda_.11
= control target key start
LH: loop header
LB: loop body
LE: loop exit
PB: predicated region body
PF: predicated region fallthrough
CT: control target
= control target key end

     0   :  { %v893_v1 = vmov 0.0   ;;  %vm894_vm0 = vmmov 0   ;;  %s1166_s1 = inlined_call_operand.vmem [shape: bf16[384,384], index: 1, kind: input, shape index: {}]   ;;  %s1167_s0 = inlined_call_operand.vmem [shape: f32[8,384], index: 0, kind: input, shape index: {}]   ;;  %s1168_s2 = inlined_call_operand.vmem [shape: f32[1,384], index: 2, kind: input, shape index: {}]   ;;  %s1169_s3 = inlined_call_operand.vmem [shape: f32[8,384], index: 3, kind: output, shape index: {}]  }
   0x1   :  { %v797_v0 = vld [vmem:[%s1166_s1 + $0xac] ss:$12 sps:$4 sm:$0xff]   ;;  %586 = vmatprep.mubr.f32.mxu1 %v893_v1  ;;  %v799_v2 = vld [vmem:[%s1166_s1 + $0xa8] ss:$12 sps:$4 sm:$0xff]   ;;  %v802_v4 = vld [vmem:[%s1166_s1 + $0x90] ss:$12 sps:$4 sm:$0xff]  }
   0x2   :  { %515 = vmatprep.subr.bf16.mxu0 %v797_v0  ;;  %v800_v3 = vld [vmem:[%s1166_s1 + $0x94] ss:$12 sps:$4 sm:$0xff]   ;;  %v803_v5 = vld [vmem:[%s1166_s1 + $0x7c] ss:$12 sps:$4 sm:$0xff]   ;;  %v805_v6 = vld [vmem:[%s1166_s1 + $0x78] ss:$12 sps:$4 sm:$0xff]  }
   0x3   :  { %516 = vmatpush1.bf16.msra.mxu0 %v799_v2  ;;  %v806_v7 = vld [vmem:[%s1166_s1 + $0x64] ss:$12 sps:$4 sm:$0xff]   ;;  %v817_v8 = vld [vmem:[%s1166_s1 + $0x22c] ss:$12 sps:$4 sm:$0xff]   ;;  %v820_v9 = vld [vmem:[%s1166_s1 + $0x228] ss:$12 sps:$4 sm:$0xff]  }
   0x4   :  { %517 = vmatprep.subr.bf16.mxu0 %v800_v3  ;;  %v808_v10 = vld [vmem:[%s1166_s1 + $0x60] ss:$12 sps:$4 sm:$0xff]   ;;  %554 = vmatprep.subr.bf16.mxu1 %v817_v8  ;;  %v826_v13 = vld [vmem:[%s1166_s1 + $0x210] ss:$12 sps:$4 sm:$0xff]   ;;  %v811_v14 = vld [vmem:[%s1166_s1 + $0x48] ss:$12 sps:$4 sm:$0xff]  }
   0x5   :  { %v809_v11 = vld [vmem:[%s1166_s1 + $0x4c] ss:$12 sps:$4 sm:$0xff]   ;;  %555 = vmatpush1.bf16.msra.mxu1 %v820_v9  ;;  %v823_v12 = vld [vmem:[%s1166_s1 + $0x214] ss:$12 sps:$4 sm:$0xff]   ;;  %v829_v16 = vld [vmem:[%s1166_s1 + $0x1fc] ss:$12 sps:$4 sm:$0xff]  }
   0x6   :  { %556 = vmatprep.subr.bf16.mxu1 %v823_v12  ;;  %v812_v15 = vld [vmem:[%s1166_s1 + $0x34] ss:$12 sps:$4 sm:$0xff]   ;;  %v832_v17 = vld [vmem:[%s1166_s1 + $0x1f8] ss:$12 sps:$4 sm:$0xff]   ;;  %v814_v19 = vld [vmem:[%s1166_s1 + $0x30] ss:$12 sps:$4 sm:$0xff]  }
   0x7   :  { %518 = vmatpush1.bf16.msra.mxu0 %v802_v4  ;;  %v835_v18 = vld [vmem:[%s1166_s1 + $0x1e4] ss:$12 sps:$4 sm:$0xff]   ;;  %v815_v20 = vld [vmem:[%s1166_s1 + $0x1c] ss:$12 sps:$4 sm:$0xff]   ;;  %v838_v21 = vld [vmem:[%s1166_s1 + $0x1e0] ss:$12 sps:$4 sm:$0xff]  }
   0x8   :  { %519 = vmatprep.subr.bf16.mxu0 %v803_v5  ;;  %v841_v22 = vld [vmem:[%s1166_s1 + $0x1cc] ss:$12 sps:$4 sm:$0xff]   ;;  %v821_v24 = vld [vmem:[%s1166_s1 + $0x4] ss:$12 sps:$4 sm:$0xff]   ;;  %v844_v25 = vld [vmem:[%s1166_s1 + $0x1c8] ss:$12 sps:$4 sm:$0xff]  }
   0x9   :  { %557 = vmatpush1.bf16.msra.mxu1 %v826_v13  ;;  %v819_v23 = vld [vmem:[%s1166_s1 + $0x18] ss:$12 sps:$4 sm:$0xff]   ;;  %v847_v26 = vld [vmem:[%s1166_s1 + $0x1b4] ss:$12 sps:$4 sm:$0xff]   ;;  %v850_v29 = vld [vmem:[%s1166_s1 + $0x1b0] ss:$12 sps:$4 sm:$0xff]   ;;  %v116_v13 = vlaneseq }
   0xa   :  { %558 = vmatprep.subr.bf16.mxu1 %v829_v16  ;;  %v825_v27 = vld [vmem:[%s1166_s1] ss:$12 sps:$4 sm:$0xff]   ;;  %v853_v30 = vld [vmem:[%s1166_s1 + $0x19c] ss:$12 sps:$4 sm:$0xff]   ;;  %v856_v33 = vld [vmem:[%s1166_s1 + $0x198] ss:$12 sps:$4 sm:$0xff]  }
   0xb   :  { %520 = vmatpush1.bf16.msra.mxu0 %v805_v6  ;;  %v827_v28 = vld [vmem:[%s1166_s1 + $0x16c] ss:$12 sps:$4 sm:$0xff]   ;;  %v831_v31 = vld [vmem:[%s1166_s1 + $0x168] ss:$12 sps:$4 sm:$0xff]   ;;  %v859_v34 = vld [vmem:[%s1166_s1 + $0x184] ss:$12 sps:$4 sm:$0xff]  }
   0xc   :  { %521 = vmatprep.subr.bf16.mxu0 %v806_v7  ;;  %v833_v32 = vld [vmem:[%s1166_s1 + $0x154] ss:$12 sps:$4 sm:$0xff]   ;;  %v837_v35 = vld [vmem:[%s1166_s1 + $0x150] ss:$12 sps:$4 sm:$0xff]   ;;  %v16_v38 = vld [vmem:[%s1167_s0 + $0x8] sm:$0xff] }
   0xd   :  { %559 = vmatpush1.bf16.msra.mxu1 %v832_v17  ;;  %v839_v36 = vld [vmem:[%s1166_s1 + $0x13c] ss:$12 sps:$4 sm:$0xff]   ;;  %v862_v37 = vld [vmem:[%s1166_s1 + $0x180] ss:$12 sps:$4 sm:$0xff]   ;;  %v843_v39 = vld [vmem:[%s1166_s1 + $0x138] ss:$12 sps:$4 sm:$0xff]   ;;  %547 = vmatprep.mubr.f32.mxu0 %v16_v38 }
   0xe   :  { %560 = vmatprep.subr.bf16.mxu1 %v835_v18  ;;  %v865_v40 = vld [vmem:[%s1166_s1 + $0x170] ss:$12 sps:$4 sm:$0xff]   ;;  %v870_v44 = vld [vmem:[%s1166_s1 + $0x158] ss:$12 sps:$4 sm:$0xff]   ;;  %v849_v45 = vld [vmem:[%s1166_s1 + $0x120] ss:$12 sps:$4 sm:$0xff]  }
   0xf   :  { %522 = vmatpush1.bf16.msra.mxu0 %v808_v10  ;;  %v845_v41 = vld [vmem:[%s1166_s1 + $0x124] ss:$12 sps:$4 sm:$0xff]   ;;  %v851_v46 = vld [vmem:[%s1166_s1 + $0x10c] ss:$12 sps:$4 sm:$0xff]   ;;  %v855_v49 = vld [vmem:[%s1166_s1 + $0x108] ss:$12 sps:$4 sm:$0xff]  }
  0x10   :  { %523 = vmatprep.subr.bf16.mxu0 %v809_v11  ;;  %v1042_v42 = vld [vmem:[%s1167_s0 + $0x10] sm:$0xff]  ;;  %v872_v47 = vld [vmem:[%s1166_s1 + $0x98] ss:$12 sps:$4 sm:$0xff]   ;;  %v873_v48 = vld [vmem:[%s1166_s1 + $0x140] ss:$12 sps:$4 sm:$0xff]  }
  0x11   :  { %561 = vmatpush1.bf16.msra.mxu1 %v838_v21  ;;  %v867_v43 = vld [vmem:[%s1166_s1 + $0xb0] ss:$12 sps:$4 sm:$0xff]   ;;  %v857_v50 = vld [vmem:[%s1166_s1 + $0xf4] ss:$12 sps:$4 sm:$0xff]   ;;  %v866_v57 = vld [vmem:[%s1166_s1 + $0xd8] ss:$12 sps:$4 sm:$0xff]  }
  0x12   :  { %562 = vmatprep.subr.bf16.mxu1 %v841_v22  ;;  %v874_v51 = vld [vmem:[%s1166_s1 + $0x80] ss:$12 sps:$4 sm:$0xff]   ;;  %v876_v52 = vld [vmem:[%s1166_s1 + $0x128] ss:$12 sps:$4 sm:$0xff]   ;;  %v861_v53 = vld [vmem:[%s1166_s1 + $0xf0] ss:$12 sps:$4 sm:$0xff]  }
  0x13   :  { %524 = vmatpush1.bf16.msra.mxu0 %v811_v14  ;;  %v863_v54 = vld [vmem:[%s1166_s1 + $0xdc] ss:$12 sps:$4 sm:$0xff]   ;;  %v868_v58 = vld [vmem:[%s1166_s1 + $0xc4] ss:$12 sps:$4 sm:$0xff]   ;;  %v871_v61 = vld [vmem:[%s1166_s1 + $0xc0] ss:$12 sps:$4 sm:$0xff]  }
  0x14   :  { %525 = vmatprep.subr.bf16.mxu0 %v812_v15  ;;  %v877_v55 = vld [vmem:[%s1166_s1 + $0x68] ss:$12 sps:$4 sm:$0xff]   ;;  %v879_v56 = vld [vmem:[%s1166_s1 + $0x110] ss:$12 sps:$4 sm:$0xff]   ;;  %v882_v60 = vld [vmem:[%s1166_s1 + $0xf8] ss:$12 sps:$4 sm:$0xff]  }
  0x15   :  { %563 = vmatpush1.bf16.msra.mxu1 %v844_v25  ;;  %v880_v59 = vld [vmem:[%s1166_s1 + $0x50] ss:$12 sps:$4 sm:$0xff]   ;;  %v883_v62 = vld [vmem:[%s1166_s1 + $0x38] ss:$12 sps:$4 sm:$0xff]   ;;  %v885_v63 = vld [vmem:[%s1166_s1 + $0xe0] ss:$12 sps:$4 sm:$0xff]  }
  0x16   :  { %564 = vmatprep.subr.bf16.mxu1 %v847_v26  ;;  %v15_v0 = vld [vmem:[%s1167_s0] sm:$0xff]  ;;  %v875_v2 = vld [vmem:[%s1166_s1 + $0x230] ss:$12 sps:$4 sm:$0xff]   ;;  %v888_v4 = vld [vmem:[%s1166_s1 + $0xc8] ss:$12 sps:$4 sm:$0xff]   ;;  %v117_v14 = vshrl.u32 %v116_v13, 7 }
  0x17   :  { %526 = vmatpush1.bf16.msra.mxu0 %v814_v19  ;;  %v886_v3 = vld [vmem:[%s1166_s1 + $0x20] ss:$12 sps:$4 sm:$0xff]   ;;  %v878_v5 = vld [vmem:[%s1166_s1 + $0x218] ss:$12 sps:$4 sm:$0xff]   ;;  %v889_v6 = vld [vmem:[%s1166_s1 + $0x8] ss:$12 sps:$4 sm:$0xff]  }
  0x18   :  { %527 = vmatprep.subr.bf16.mxu0 %v815_v20  ;;  %v881_v7 = vld [vmem:[%s1166_s1 + $0x200] ss:$12 sps:$4 sm:$0xff]   ;;  %v884_v8 = vld [vmem:[%s1166_s1 + $0x1e8] ss:$12 sps:$4 sm:$0xff]   ;;  %v887_v9 = vld [vmem:[%s1166_s1 + $0x1d0] ss:$12 sps:$4 sm:$0xff]  }
  0x19   :  { %565 = vmatpush1.bf16.msra.mxu1 %v850_v29  ;;  %v890_v10 = vld [vmem:[%s1166_s1 + $0x1b8] ss:$12 sps:$4 sm:$0xff]   ;;  %v891_v11 = vld [vmem:[%s1166_s1 + $0x1a0] ss:$12 sps:$4 sm:$0xff]   ;;  %v892_v12 = vld [vmem:[%s1166_s1 + $0x188] ss:$12 sps:$4 sm:$0xff]  }
  0x1a   :  { %566 = vmatprep.subr.bf16.mxu1 %v853_v30  ;;  %v118_v15 = vsub.s32 0, %v117_v14  ;;  %v114_v16 = vld [vmem:[%s1168_s2] sm:$0x7]  ;;  %v122_v17 = vsub.s32 1, %v117_v14 }
  0x1b   :  { %528 = vmatpush1.bf16.msra.mxu0 %v819_v23 }
  0x1c   :  { %529 = vmatprep.subr.bf16.mxu0 %v821_v24  ;;  %v119_v18 = vrot.slane %v114_v16, %v118_v15  ;;  %v123_v19 = vrot.slane %v114_v16, %v122_v17 }
  0x1d   :  { %567 = vmatpush1.bf16.msra.mxu1 %v856_v33 }
  0x1e   :  { %568 = vmatprep.subr.bf16.mxu1 %v859_v34 }
  0x1f   :  { %530 = vmatpush1.bf16.msra.mxu0 %v825_v27 }
  0x20   :  { %531 = vmatprep.subr.bf16.mxu0 %v827_v28  ;;  %v126_v28 = vsub.s32 2, %v117_v14 }
  0x21   :  { %569 = vmatpush1.bf16.msra.mxu1 %v862_v37 }
  0x22   :  { %748 = vmatprep.subr.bf16.mxu1 %v865_v40 }
  0x23   :  { %532 = vmatpush2.bf16.msra.mxu0 %v831_v31  ;;  %v127_v31 = vrot.slane %v114_v16, %v126_v28 }
  0x24   :  { %533 = vmatprep.subr.bf16.mxu0 %v833_v32  ;;  %587 = vmatmul.mubr.f32.vlgmr.msra.gmra.mxu1 %v1042_v42 }
  0x25   :  { %749 = vmatpush3.bf16.msra.mxu1 %v867_v43  ;;  %625 = vmatprep.mubr.f32.mxu1 %v16_v38 }
  0x26   :  { %750 = vmatprep.subr.bf16.mxu1 %v870_v44 }
  0x27   :  { %534 = vmatpush2.bf16.msra.mxu0 %v837_v35 }
  0x28   :  { %535 = vmatprep.subr.bf16.mxu0 %v839_v36 }
  0x29   :  { %751 = vmatpush3.bf16.msra.mxu1 %v872_v47 }
  0x2a   :  { %752 = vmatprep.subr.bf16.mxu1 %v873_v48 }
  0x2b   :  { %536 = vmatpush2.bf16.msra.mxu0 %v843_v39 }
  0x2c   :  { %537 = vmatprep.subr.bf16.mxu0 %v845_v41 }
  0x2d   :  { %753 = vmatpush3.bf16.msra.mxu1 %v874_v51 }
  0x2e   :  { %754 = vmatprep.subr.bf16.mxu1 %v876_v52 }
  0x2f   :  { %538 = vmatpush2.bf16.msra.mxu0 %v849_v45 }
  0x30   :  { %539 = vmatprep.subr.bf16.mxu0 %v851_v46 }
  0x31   :  { %755 = vmatpush3.bf16.msra.mxu1 %v877_v55 }
  0x32   :  { %756 = vmatprep.subr.bf16.mxu1 %v879_v56 }
  0x33   :  { %540 = vmatpush2.bf16.msra.mxu0 %v855_v49 }
  0x34   :  { %541 = vmatprep.subr.bf16.mxu0 %v857_v50 }
  0x35   :  { %757 = vmatpush3.bf16.msra.mxu1 %v880_v59 }
  0x36   :  { %758 = vmatprep.subr.bf16.mxu1 %v882_v60 }
  0x37   :  { %542 = vmatpush2.bf16.msra.mxu0 %v861_v53 }
  0x38   :  { %543 = vmatprep.subr.bf16.mxu0 %v863_v54 }
  0x39   :  { %759 = vmatpush3.bf16.msra.mxu1 %v883_v62 }
  0x3a   :  { %760 = vmatprep.subr.bf16.mxu1 %v885_v63 }
  0x3b   :  { %544 = vmatpush2.bf16.msra.mxu0 %v866_v57 }
  0x3c   :  { %545 = vmatprep.subr.bf16.mxu0 %v868_v58 }
  0x3d   :  { %761 = vmatpush3.bf16.msra.mxu1 %v886_v3 }
  0x3e   :  { %762 = vmatprep.subr.bf16.mxu1 %v888_v4 }
  0x3f   :  { %546 = vmatpush2.bf16.msra.mxu0 %v871_v61 }
  0x40   :  { %776 = vmatprep.subr.bf16.mxu0 %v893_v1 }
  0x41   :  { %763 = vmatpush3.bf16.msra.mxu1 %v889_v6 }
  0x42   :  { %548 = vmatmul.mubr.f32.vlgmr.msra.gmra.mxu0 %v15_v0 }
  0x43   :  { %777 = vmatpush3.bf16.msra.mxu0 %v875_v2  ;;  %792 = vmatprep.mubr.msk.f32.mxu0 %vm894_vm0, %v893_v1 }
  0x44   :  { %778 = vmatprep.subr.bf16.mxu0 %v893_v1  ;;  %626 = vmatmul.mubr.f32.vlgmr.msra.gmra.mxu1 %v15_v0 }
  0x47   :  { %779 = vmatpush3.bf16.msra.mxu0 %v878_v5 }
  0x48   :  { %780 = vmatprep.subr.bf16.mxu0 %v893_v1 }
  0x4b   :  { %781 = vmatpush3.bf16.msra.mxu0 %v881_v7 }
  0x4c   :  { %782 = vmatprep.subr.bf16.mxu0 %v893_v1 }
  0x4f   :  { %783 = vmatpush3.bf16.msra.mxu0 %v884_v8 }
  0x50   :  { %784 = vmatprep.subr.bf16.mxu0 %v893_v1 }
  0x53   :  { %785 = vmatpush3.bf16.msra.mxu0 %v887_v9 }
  0x54   :  { %786 = vmatprep.subr.bf16.mxu0 %v893_v1 }
  0x57   :  { %787 = vmatpush3.bf16.msra.mxu0 %v890_v10 }
  0x58   :  { %788 = vmatprep.subr.bf16.mxu0 %v893_v1 }
  0x5b   :  { %789 = vmatpush3.bf16.msra.mxu0 %v891_v11 }
  0x5c   :  { %790 = vmatprep.subr.bf16.mxu0 %v893_v1 }
  0x5f   :  { %791 = vmatpush3.bf16.msra.mxu0 %v892_v12 }
  0x62   :  { %793 = vmatmul.mubr.f32.vlgmr.msra.gmra.mxu0 %v1042_v42 }
  0xe4   :  { %v588_v20 = vpop.f32.mrf.mxu1 }
  0xe6   :  { %v590_v1 = vpop.f32.mrf.mxu1 }
 0x102   :  { %v549_v21 = vpop.f32.mrf.mxu0 }
 0x103   :  { %v550_v22 = vadd.f32 %v549_v21, %v119_v18 }
 0x104   :  { %v551_v23 = vpop.f32.mrf.mxu0  ;;  %v764_v27 = vpop.f32.mrf.mxu1 }
 0x105   :  { %v589_v24 = vadd.f32 %v588_v20, %v550_v22  ;;  %v552_v25 = vadd.f32 %v551_v23, %v123_v19 }
 0x106   :  { %v765_v29 = vpop.f32.mrf.mxu1 }
 0x107   :  { %669 = vst [vmem:[%s1169_s3] sm:$0xff] %v589_v24  ;;  %v591_v26 = vadd.f32 %v590_v1, %v552_v25  ;;  %v766_v30 = vadd.f32 %v765_v29, %v764_v27 }
 0x109   :  { %670 = vst [vmem:[%s1169_s3 + $0x8] sm:$0xff] %v591_v26  ;;  %v628_v32 = vadd.f32 %v766_v30, %v127_v31 }
 0x122   :  { %v665_v33 = vpop.f32.mrf.mxu0 }
 0x123   :  { %v666_v34 = vadd.f32 %v665_v33, %v628_v32 }
 0x124   :  { %v794_v35 = vpop.f32.mrf.mxu0 }
 0x125   :  { %671 = vst [vmem:[%s1169_s3 + $0x10] sm:$0xff] %v666_v34 }

// kernel: _lambda_.10
= control target key start
LH: loop header
LB: loop body
LE: loop exit
PB: predicated region body
PF: predicated region fallthrough
CT: control target
= control target key end

     0   :  { %8 = vsyncpa [#allocation3], 0  ;;  %s933_s12 = smov [#allocation2]   ;;  %s996_s0 = inlined_call_operand.vmem [shape: f32[8,384], index: 0, kind: input, shape index: {}]   ;;  %s997_s1 = inlined_call_operand.hbm [shape: bf16[384,384], index: 1, kind: input, shape index: {}]   ;;  %s998_s2 = inlined_call_operand.vmem [shape: f32[1,384], index: 2, kind: input, shape index: {}]   ;;  %s999_s3 = inlined_call_operand.vmem [shape: f32[8,384], index: 3, kind: output, shape index: {}]  }
   0x1   :  { %s16_s13 = sshll.u32 %s933_s12, 4  ;;  %s17_s13 = int_to_ptr.vmem [resolvable:$true] %s16_s13 }
   0x2   :  { %s919_s14 = scalar_lea.vmem %s17_s13, 9216  ;;  %p924_p1 = scmp.lt.s32.totalorder %s17_s13, %s17_s13 }
   0x3   :  { %p920_p0 = scmp.ne.s32.totalorder %s17_s13, %s919_s14  ;;  %p925_p2 = scmp.lt.s32.totalorder %s919_s14, %s919_s14 }
   0x5   :  { %p926_p3 = por %p925_p2, %p924_p1 }
   0x7   :  { %p927_p4 = pnand %p926_p3, %p920_p0 }
   0x9   :  { %930 = shalt.err (!%p927_p4)
}
   0xa   :  { %s934_s15 = smov 192   ;;  %s935_s16 = smov 12  }
   0xb   :  { %22 = dma.hbm_to_vmem [thread:$0]  %s997_s1, 9216, %s17_s13, [#allocation3], %s934_s15, %s934_s15, %s935_s16  }
   0xc   :  { %931 = dma.done.wait [#allocation3], 9216  }
   0xd   :  { %932 = vsyncadd [#allocation3], 4294958080  ;;  %v936_v0 = vmov 0.0   ;;  %v815_v1 = vld [vmem:[#allocation2 + $0xac] ss:$12 sps:$4 sm:$0xff]   ;;  %v968_v42 = vld [vmem:[%s996_s0 + $0x10] sm:$0xff] }
   0xe   :  { %600 = vmatprep.mubr.f32.mxu1 %v936_v0  ;;  %v817_v2 = vld [vmem:[#allocation2 + $0xa8] ss:$12 sps:$4 sm:$0xff]   ;;  %529 = vmatprep.subr.bf16.mxu0 %v815_v1  ;;  %v820_v4 = vld [vmem:[#allocation2 + $0x90] ss:$12 sps:$4 sm:$0xff]   ;;  %v823_v6 = vld [vmem:[#allocation2 + $0x78] ss:$12 sps:$4 sm:$0xff]  }
   0xf   :  { %v818_v3 = vld [vmem:[#allocation2 + $0x94] ss:$12 sps:$4 sm:$0xff]   ;;  %530 = vmatpush1.bf16.msra.mxu0 %v817_v2  ;;  %v821_v5 = vld [vmem:[#allocation2 + $0x7c] ss:$12 sps:$4 sm:$0xff]   ;;  %v824_v7 = vld [vmem:[#allocation2 + $0x64] ss:$12 sps:$4 sm:$0xff]  }
  0x10   :  { %531 = vmatprep.subr.bf16.mxu0 %v818_v3  ;;  %v835_v8 = vld [vmem:[#allocation2 + $0x22c] ss:$12 sps:$4 sm:$0xff]   ;;  %v838_v9 = vld [vmem:[#allocation2 + $0x228] ss:$12 sps:$4 sm:$0xff]   ;;  %v844_v13 = vld [vmem:[#allocation2 + $0x210] ss:$12 sps:$4 sm:$0xff]  }
  0x11   :  { %v826_v10 = vld [vmem:[#allocation2 + $0x60] ss:$12 sps:$4 sm:$0xff]   ;;  %568 = vmatprep.subr.bf16.mxu1 %v835_v8  ;;  %v829_v14 = vld [vmem:[#allocation2 + $0x48] ss:$12 sps:$4 sm:$0xff]   ;;  %v850_v17 = vld [vmem:[#allocation2 + $0x1f8] ss:$12 sps:$4 sm:$0xff]  }
  0x12   :  { %v827_v11 = vld [vmem:[#allocation2 + $0x4c] ss:$12 sps:$4 sm:$0xff]   ;;  %569 = vmatpush1.bf16.msra.mxu1 %v838_v9  ;;  %v841_v12 = vld [vmem:[#allocation2 + $0x214] ss:$12 sps:$4 sm:$0xff]   ;;  %v847_v16 = vld [vmem:[#allocation2 + $0x1fc] ss:$12 sps:$4 sm:$0xff]  }
  0x13   :  { %532 = vmatpush1.bf16.msra.mxu0 %v820_v4  ;;  %570 = vmatprep.subr.bf16.mxu1 %v841_v12  ;;  %v830_v15 = vld [vmem:[#allocation2 + $0x34] ss:$12 sps:$4 sm:$0xff]   ;;  %v853_v18 = vld [vmem:[#allocation2 + $0x1e4] ss:$12 sps:$4 sm:$0xff]   ;;  %v833_v20 = vld [vmem:[#allocation2 + $0x1c] ss:$12 sps:$4 sm:$0xff]  }
  0x14   :  { %533 = vmatprep.subr.bf16.mxu0 %v821_v5  ;;  %v832_v19 = vld [vmem:[#allocation2 + $0x30] ss:$12 sps:$4 sm:$0xff]   ;;  %v856_v21 = vld [vmem:[#allocation2 + $0x1e0] ss:$12 sps:$4 sm:$0xff]   ;;  %v837_v23 = vld [vmem:[#allocation2 + $0x18] ss:$12 sps:$4 sm:$0xff]  }
  0x15   :  { %v859_v22 = vld [vmem:[#allocation2 + $0x1cc] ss:$12 sps:$4 sm:$0xff]   ;;  %v839_v24 = vld [vmem:[#allocation2 + $0x4] ss:$12 sps:$4 sm:$0xff]   ;;  %v862_v25 = vld [vmem:[#allocation2 + $0x1c8] ss:$12 sps:$4 sm:$0xff]  }
  0x16   :  { %571 = vmatpush1.bf16.msra.mxu1 %v844_v13  ;;  %v865_v26 = vld [vmem:[#allocation2 + $0x1b4] ss:$12 sps:$4 sm:$0xff]   ;;  %v845_v28 = vld [vmem:[#allocation2 + $0x16c] ss:$12 sps:$4 sm:$0xff]   ;;  %v868_v29 = vld [vmem:[#allocation2 + $0x1b0] ss:$12 sps:$4 sm:$0xff]   ;;  %v130_v13 = vlaneseq }
  0x17   :  { %534 = vmatpush1.bf16.msra.mxu0 %v823_v6  ;;  %572 = vmatprep.subr.bf16.mxu1 %v847_v16  ;;  %v843_v27 = vld [vmem:[#allocation2] ss:$12 sps:$4 sm:$0xff]   ;;  %v871_v30 = vld [vmem:[#allocation2 + $0x19c] ss:$12 sps:$4 sm:$0xff]   ;;  %v874_v33 = vld [vmem:[#allocation2 + $0x198] ss:$12 sps:$4 sm:$0xff]  }
  0x18   :  { %535 = vmatprep.subr.bf16.mxu0 %v824_v7  ;;  %v849_v31 = vld [vmem:[#allocation2 + $0x168] ss:$12 sps:$4 sm:$0xff]   ;;  %v877_v34 = vld [vmem:[#allocation2 + $0x184] ss:$12 sps:$4 sm:$0xff]   ;;  %v880_v37 = vld [vmem:[#allocation2 + $0x180] ss:$12 sps:$4 sm:$0xff]  }
  0x19   :  { %v851_v32 = vld [vmem:[#allocation2 + $0x154] ss:$12 sps:$4 sm:$0xff]   ;;  %v855_v35 = vld [vmem:[#allocation2 + $0x150] ss:$12 sps:$4 sm:$0xff]   ;;  %v30_v38 = vld [vmem:[%s996_s0 + $0x8] sm:$0xff]  ;;  %vm937_vm0 = vmmov 0  }
  0x1a   :  { %573 = vmatpush1.bf16.msra.mxu1 %v850_v17  ;;  %v857_v36 = vld [vmem:[#allocation2 + $0x13c] ss:$12 sps:$4 sm:$0xff]   ;;  %v861_v39 = vld [vmem:[#allocation2 + $0x138] ss:$12 sps:$4 sm:$0xff]   ;;  %561 = vmatprep.mubr.f32.mxu0 %v30_v38  ;;  %v867_v45 = vld [vmem:[#allocation2 + $0x120] ss:$12 sps:$4 sm:$0xff]  }
  0x1b   :  { %536 = vmatpush1.bf16.msra.mxu0 %v826_v10  ;;  %574 = vmatprep.subr.bf16.mxu1 %v853_v18  ;;  %v883_v40 = vld [vmem:[#allocation2 + $0x170] ss:$12 sps:$4 sm:$0xff]   ;;  %v888_v44 = vld [vmem:[#allocation2 + $0x158] ss:$12 sps:$4 sm:$0xff]   ;;  %v891_v48 = vld [vmem:[#allocation2 + $0x140] ss:$12 sps:$4 sm:$0xff]  }
  0x1c   :  { %537 = vmatprep.subr.bf16.mxu0 %v827_v11  ;;  %v863_v41 = vld [vmem:[#allocation2 + $0x124] ss:$12 sps:$4 sm:$0xff]   ;;  %v869_v46 = vld [vmem:[#allocation2 + $0x10c] ss:$12 sps:$4 sm:$0xff]   ;;  %v873_v49 = vld [vmem:[#allocation2 + $0x108] ss:$12 sps:$4 sm:$0xff]  }
  0x1d   :  { %v885_v43 = vld [vmem:[#allocation2 + $0xb0] ss:$12 sps:$4 sm:$0xff]   ;;  %v890_v47 = vld [vmem:[#allocation2 + $0x98] ss:$12 sps:$4 sm:$0xff]   ;;  %v875_v50 = vld [vmem:[#allocation2 + $0xf4] ss:$12 sps:$4 sm:$0xff]  }
  0x1e   :  { %575 = vmatpush1.bf16.msra.mxu1 %v856_v21  ;;  %v892_v51 = vld [vmem:[#allocation2 + $0x80] ss:$12 sps:$4 sm:$0xff]   ;;  %v894_v52 = vld [vmem:[#allocation2 + $0x128] ss:$12 sps:$4 sm:$0xff]   ;;  %v879_v53 = vld [vmem:[#allocation2 + $0xf0] ss:$12 sps:$4 sm:$0xff]  }
  0x1f   :  { %538 = vmatpush1.bf16.msra.mxu0 %v829_v14  ;;  %576 = vmatprep.subr.bf16.mxu1 %v859_v22  ;;  %v881_v54 = vld [vmem:[#allocation2 + $0xdc] ss:$12 sps:$4 sm:$0xff]   ;;  %v884_v57 = vld [vmem:[#allocation2 + $0xd8] ss:$12 sps:$4 sm:$0xff]   ;;  %v889_v61 = vld [vmem:[#allocation2 + $0xc0] ss:$12 sps:$4 sm:$0xff]  }
  0x20   :  { %539 = vmatprep.subr.bf16.mxu0 %v830_v15  ;;  %v895_v55 = vld [vmem:[#allocation2 + $0x68] ss:$12 sps:$4 sm:$0xff]   ;;  %v897_v56 = vld [vmem:[#allocation2 + $0x110] ss:$12 sps:$4 sm:$0xff]   ;;  %v900_v60 = vld [vmem:[#allocation2 + $0xf8] ss:$12 sps:$4 sm:$0xff]  }
  0x21   :  { %v886_v58 = vld [vmem:[#allocation2 + $0xc4] ss:$12 sps:$4 sm:$0xff]   ;;  %v903_v63 = vld [vmem:[#allocation2 + $0xe0] ss:$12 sps:$4 sm:$0xff]   ;;  %v906_v4 = vld [vmem:[#allocation2 + $0xc8] ss:$12 sps:$4 sm:$0xff]  }
  0x22   :  { %577 = vmatpush1.bf16.msra.mxu1 %v862_v25  ;;  %v898_v59 = vld [vmem:[#allocation2 + $0x50] ss:$12 sps:$4 sm:$0xff]   ;;  %v901_v62 = vld [vmem:[#allocation2 + $0x38] ss:$12 sps:$4 sm:$0xff]   ;;  %v904_v3 = vld [vmem:[#allocation2 + $0x20] ss:$12 sps:$4 sm:$0xff]  }
  0x23   :  { %540 = vmatpush1.bf16.msra.mxu0 %v832_v19  ;;  %578 = vmatprep.subr.bf16.mxu1 %v865_v26  ;;  %v29_v1 = vld [vmem:[%s996_s0] sm:$0xff]  ;;  %v893_v2 = vld [vmem:[#allocation2 + $0x230] ss:$12 sps:$4 sm:$0xff]   ;;  %v907_v6 = vld [vmem:[#allocation2 + $0x8] ss:$12 sps:$4 sm:$0xff]   ;;  %v131_v14 = vshrl.u32 %v130_v13, 7 }
  0x24   :  { %541 = vmatprep.subr.bf16.mxu0 %v833_v20  ;;  %v896_v5 = vld [vmem:[#allocation2 + $0x218] ss:$12 sps:$4 sm:$0xff]   ;;  %v899_v7 = vld [vmem:[#allocation2 + $0x200] ss:$12 sps:$4 sm:$0xff]   ;;  %v902_v8 = vld [vmem:[#allocation2 + $0x1e8] ss:$12 sps:$4 sm:$0xff]  }
  0x25   :  { %v905_v9 = vld [vmem:[#allocation2 + $0x1d0] ss:$12 sps:$4 sm:$0xff]   ;;  %v908_v10 = vld [vmem:[#allocation2 + $0x1b8] ss:$12 sps:$4 sm:$0xff]   ;;  %v909_v11 = vld [vmem:[#allocation2 + $0x1a0] ss:$12 sps:$4 sm:$0xff]  }
  0x26   :  { %579 = vmatpush1.bf16.msra.mxu1 %v868_v29  ;;  %v910_v12 = vld [vmem:[#allocation2 + $0x188] ss:$12 sps:$4 sm:$0xff]   ;;  %v132_v15 = vsub.s32 0, %v131_v14  ;;  %v128_v16 = vld [vmem:[%s998_s2] sm:$0x7]  ;;  %v136_v17 = vsub.s32 1, %v131_v14 }
  0x27   :  { %542 = vmatpush1.bf16.msra.mxu0 %v837_v23  ;;  %580 = vmatprep.subr.bf16.mxu1 %v871_v30 }
  0x28   :  { %543 = vmatprep.subr.bf16.mxu0 %v839_v24  ;;  %v133_v18 = vrot.slane %v128_v16, %v132_v15  ;;  %v137_v19 = vrot.slane %v128_v16, %v136_v17 }
  0x2a   :  { %581 = vmatpush1.bf16.msra.mxu1 %v874_v33 }
  0x2b   :  { %544 = vmatpush1.bf16.msra.mxu0 %v843_v27  ;;  %582 = vmatprep.subr.bf16.mxu1 %v877_v34 }
  0x2c   :  { %545 = vmatprep.subr.bf16.mxu0 %v845_v28  ;;  %v140_v28 = vsub.s32 2, %v131_v14 }
  0x2e   :  { %583 = vmatpush1.bf16.msra.mxu1 %v880_v37 }
  0x2f   :  { %546 = vmatpush2.bf16.msra.mxu0 %v849_v31  ;;  %763 = vmatprep.subr.bf16.mxu1 %v883_v40  ;;  %v141_v31 = vrot.slane %v128_v16, %v140_v28 }
  0x30   :  { %547 = vmatprep.subr.bf16.mxu0 %v851_v32 }
  0x31   :  { %601 = vmatmul.mubr.f32.vlgmr.msra.gmra.mxu1 %v968_v42 }
  0x32   :  { %764 = vmatpush3.bf16.msra.mxu1 %v885_v43  ;;  %639 = vmatprep.mubr.f32.mxu1 %v30_v38 }
  0x33   :  { %548 = vmatpush2.bf16.msra.mxu0 %v855_v35  ;;  %765 = vmatprep.subr.bf16.mxu1 %v888_v44 }
  0x34   :  { %549 = vmatprep.subr.bf16.mxu0 %v857_v36 }
  0x36   :  { %766 = vmatpush3.bf16.msra.mxu1 %v890_v47 }
  0x37   :  { %550 = vmatpush2.bf16.msra.mxu0 %v861_v39  ;;  %767 = vmatprep.subr.bf16.mxu1 %v891_v48 }
  0x38   :  { %551 = vmatprep.subr.bf16.mxu0 %v863_v41 }
  0x3a   :  { %768 = vmatpush3.bf16.msra.mxu1 %v892_v51 }
  0x3b   :  { %552 = vmatpush2.bf16.msra.mxu0 %v867_v45  ;;  %769 = vmatprep.subr.bf16.mxu1 %v894_v52 }
  0x3c   :  { %553 = vmatprep.subr.bf16.mxu0 %v869_v46 }
  0x3e   :  { %770 = vmatpush3.bf16.msra.mxu1 %v895_v55 }
  0x3f   :  { %554 = vmatpush2.bf16.msra.mxu0 %v873_v49  ;;  %771 = vmatprep.subr.bf16.mxu1 %v897_v56 }
  0x40   :  { %555 = vmatprep.subr.bf16.mxu0 %v875_v50 }
  0x42   :  { %772 = vmatpush3.bf16.msra.mxu1 %v898_v59 }
  0x43   :  { %556 = vmatpush2.bf16.msra.mxu0 %v879_v53  ;;  %773 = vmatprep.subr.bf16.mxu1 %v900_v60 }
  0x44   :  { %557 = vmatprep.subr.bf16.mxu0 %v881_v54 }
  0x46   :  { %774 = vmatpush3.bf16.msra.mxu1 %v901_v62 }
  0x47   :  { %558 = vmatpush2.bf16.msra.mxu0 %v884_v57  ;;  %775 = vmatprep.subr.bf16.mxu1 %v903_v63 }
  0x48   :  { %559 = vmatprep.subr.bf16.mxu0 %v886_v58 }
  0x4a   :  { %776 = vmatpush3.bf16.msra.mxu1 %v904_v3 }
  0x4b   :  { %560 = vmatpush2.bf16.msra.mxu0 %v889_v61  ;;  %777 = vmatprep.subr.bf16.mxu1 %v906_v4 }
  0x4c   :  { %791 = vmatprep.subr.bf16.mxu0 %v936_v0 }
  0x4e   :  { %562 = vmatmul.mubr.f32.vlgmr.msra.gmra.mxu0 %v29_v1  ;;  %778 = vmatpush3.bf16.msra.mxu1 %v907_v6 }
  0x4f   :  { %792 = vmatpush3.bf16.msra.mxu0 %v893_v2  ;;  %807 = vmatprep.mubr.msk.f32.mxu0 %vm937_vm0, %v936_v0 }
  0x50   :  { %793 = vmatprep.subr.bf16.mxu0 %v936_v0 }
  0x51   :  { %640 = vmatmul.mubr.f32.vlgmr.msra.gmra.mxu1 %v29_v1 }
  0x53   :  { %794 = vmatpush3.bf16.msra.mxu0 %v896_v5 }
  0x54   :  { %795 = vmatprep.subr.bf16.mxu0 %v936_v0 }
  0x57   :  { %796 = vmatpush3.bf16.msra.mxu0 %v899_v7 }
  0x58   :  { %797 = vmatprep.subr.bf16.mxu0 %v936_v0 }
  0x5b   :  { %798 = vmatpush3.bf16.msra.mxu0 %v902_v8 }
  0x5c   :  { %799 = vmatprep.subr.bf16.mxu0 %v936_v0 }
  0x5f   :  { %800 = vmatpush3.bf16.msra.mxu0 %v905_v9 }
  0x60   :  { %801 = vmatprep.subr.bf16.mxu0 %v936_v0 }
  0x63   :  { %802 = vmatpush3.bf16.msra.mxu0 %v908_v10 }
  0x64   :  { %803 = vmatprep.subr.bf16.mxu0 %v936_v0 }
  0x67   :  { %804 = vmatpush3.bf16.msra.mxu0 %v909_v11 }
  0x68   :  { %805 = vmatprep.subr.bf16.mxu0 %v936_v0 }
  0x6b   :  { %806 = vmatpush3.bf16.msra.mxu0 %v910_v12 }
  0x6e   :  { %808 = vmatmul.mubr.f32.vlgmr.msra.gmra.mxu0 %v968_v42 }
  0xf1   :  { %v602_v20 = vpop.f32.mrf.mxu1 }
  0xf3   :  { %v604_v0 = vpop.f32.mrf.mxu1 }
 0x10e   :  { %v563_v21 = vpop.f32.mrf.mxu0 }
 0x10f   :  { %v564_v22 = vadd.f32 %v563_v21, %v133_v18 }
 0x110   :  { %v565_v23 = vpop.f32.mrf.mxu0 }
 0x111   :  { %v603_v24 = vadd.f32 %v602_v20, %v564_v22  ;;  %v566_v25 = vadd.f32 %v565_v23, %v137_v19  ;;  %v779_v27 = vpop.f32.mrf.mxu1 }
 0x113   :  { %683 = vst [vmem:[%s999_s3] sm:$0xff] %v603_v24  ;;  %v605_v26 = vadd.f32 %v604_v0, %v566_v25  ;;  %v780_v29 = vpop.f32.mrf.mxu1 }
 0x114   :  { %v781_v30 = vadd.f32 %v780_v29, %v779_v27 }
 0x115   :  { %684 = vst [vmem:[%s999_s3 + $0x8] sm:$0xff] %v605_v26 }
 0x116   :  { %v642_v32 = vadd.f32 %v781_v30, %v141_v31 }
 0x12e   :  { %v679_v33 = vpop.f32.mrf.mxu0 }
 0x12f   :  { %v680_v34 = vadd.f32 %v679_v33, %v642_v32 }
 0x130   :  { %v809_v35 = vpop.f32.mrf.mxu0 }
 0x131   :  { %685 = vst [vmem:[%s999_s3 + $0x10] sm:$0xff] %v680_v34 }
 0x132   :  { %690 = vsyncpa [#allocation3], 1 }

</bundles_post_ra>
